<compile_context>
chip_gen: v6e
topology: v6e:2x2x1
jax: 0.10.0
libtpu: 0.0.40
codegen_flags: <defaults>
</compile_context>

<pallas_src>
import jax
import jax.numpy as jnp
from jax.experimental import pallas as pl
from jax.experimental.pallas import tpu as pltpu


def _round_up(x, m):
    return ((x + m - 1) // m) * m


def _vmem_capacity_bytes():
    """Physical VMEM of the current TPU generation (fallback: 64 MiB = v7x)."""
    try:
        info = pltpu.get_tpu_info()
        cap = int(getattr(info, "vmem_capacity_bytes", 0) or 0)
        if cap > 0:
            return cap
    except Exception:
        pass
    return 64 << 20


def _make_kernel(C, NB, use_mxu, x_dtype):
    """Fused 1x1-conv + bias + residual kernel for static C / NB."""

    def kernel(x_ref, w_ref, b_ref, o_ref):
        # x_ref / o_ref: (NB, C, t) — channels on sublanes, spatial on lanes.
        # w_ref: (C, C) resident weight;  b_ref: (C, 1) resident bias.
        b = b_ref[...].astype(jnp.float32)
        if use_mxu:
            # Matched operand dtypes -> native MXU path (bf16 x bf16 when the
            # activations are bf16), f32 accumulation via preferred_element_type.
            w = w_ref[...].astype(x_dtype)
        else:
            w = w_ref[...].astype(jnp.float32)

        for nb in range(NB):                      # static unroll over samples
            xb = x_ref[nb]                        # (C, t)
            if use_mxu:
                y = jnp.dot(w, xb, preferred_element_type=jnp.float32)
            else:
                # Small-C path: unrolled VPU outer-product accumulation — avoids
                # pushing a tiny (C,C) tile through the MXU result FIFO.
                xf = xb.astype(jnp.float32)
                y = w[:, 0:1] * xf[0:1, :]
                for ci in range(1, C):
                    y = y + w[:, ci:ci + 1] * xf[ci:ci + 1, :]
            y = y + b + xb.astype(jnp.float32)    # bias + residual, f32
            o_ref[nb] = y.astype(o_ref.dtype)

    return kernel


def residual_pointwise_conv(x_nchw, weight, bias, *, target_tile_bytes=2 << 20):
    """out = Conv2d_1x1(x) + x  (NCHW in / NCHW out, like the PyTorch module).

    weight: (C_out, C_in) or PyTorch's (C_out, C_in, 1, 1).
    bias:   (C_out,)
    """
    N, C, H, W = x_nchw.shape
    HW = H * W
    if weight.ndim == 4:                          # accept PyTorch conv weight
        weight = weight.reshape(weight.shape[0], weight.shape[1])
    assert weight.shape == (C, C) and bias.shape == (C,)

    # Native-layout view: (N, C, H*W).  Free reshape — no HBM transpose pass.
    x3 = x_nchw.reshape(N, C, HW)
    b2 = bias.reshape(C, 1)

    x_item = jnp.dtype(x_nchw.dtype).itemsize
    w_item = jnp.dtype(weight.dtype).itemsize

    # ---- padded (layout-true) sizes --------------------------------------
    sub_x = 8 * max(1, 4 // x_item)               # sublane tile: 8 f32 / 16 bf16
    sub_w = 8 * max(1, 4 // w_item)
    c_pad = _round_up(C, sub_x)
    hw_pad = _round_up(HW, 128)
    bytes_per_128 = c_pad * 128 * x_item          # one sample, one 128-lane slab
    sample_bytes = bytes_per_128 * (hw_pad // 128)
    w_bytes = _round_up(C, sub_w) * _round_up(C, 128) * w_item
    b_bytes = _round_up(C, sub_w) * 128 * w_item

    # Resident weight/bias: single-buffer once they are big enough to matter
    # (their block index never changes, so a second buffer is pure VMEM waste).
    single_buffer_wb = (C * C * w_item) >= (1 << 20)
    wb_buffers = 1 if single_buffer_wb else 2
    wb_total = wb_buffers * (w_bytes + b_bytes)

    # ---- generation-aware VMEM budget ------------------------------------
    cap = _vmem_capacity_bytes()                  # 64 MiB v7x, 128 MiB v5e/v6e
    usable = min(int(cap * 0.75), cap - (16 << 20))
    tiles_budget = max(usable - wb_total - (4 << 20), 1 << 20)
    # Footprint model: 2x double-buffered input tile + 2x output tile.
    tile_target = min(int(target_tile_bytes), tiles_budget // 4)
    tile_target = max(tile_target, bytes_per_128)

    # ---- pick (NB samples, t spatial lanes) per grid step ------------------
    if sample_bytes >= tile_target:
        NB = 1
        t = min(hw_pad, max(1, tile_target // bytes_per_128) * 128)
    else:
        # Whole sample is small: take full spatial extent and batch samples.
        t = hw_pad
        nb_want = int(min(tile_target // sample_bytes, N, 8))
        NB = 1
        for d in range(max(nb_want, 1), 0, -1):   # largest divisor of N <= want
            if N % d == 0:
                NB = d
                break

    grid_n = pl.cdiv(N, NB)
    grid_hw = pl.cdiv(HW, t)
    # Keep >= 2 parallel grid steps so both v7x TensorCores get work.
    if grid_n * grid_hw < 2:
        if NB > 1:
            for d in range(NB // 2, 0, -1):
                if N % d == 0:
                    NB = d
                    break
            grid_n = pl.cdiv(N, NB)
        elif hw_pad >= 256:
            t = _round_up(hw_pad // 2, 128)
            grid_hw = pl.cdiv(HW, t)

    # ---- compute path & VMEM limit -----------------------------------------
    vpu_max_c = 8 if x_item >= 4 else 16          # VALU binds past ~8 f32 / 16 bf16
    use_mxu = C > vpu_max_c
    kernel = _make_kernel(C, NB, use_mxu, x_nchw.dtype)

    tile_bytes = NB * c_pad * _round_up(t, 128) * x_item
    footprint = 4 * tile_bytes + wb_total
    vmem_limit = int(min(max(footprint + (8 << 20), 32 << 20), cap - (4 << 20)))
    # TODO(synk): for C so large that even t=128 tiles + the resident weight
    # exceed v7x's 64 MiB (~C >= 1024 f32), add a C_out grid axis streaming
    # 256-row weight slabs while keeping the (C, t) activation tile resident.

    if single_buffer_wb:
        w_spec = pl.BlockSpec((C, C), lambda n, j: (0, 0),
                              pipeline_mode=pl.Buffered(1))
        b_spec = pl.BlockSpec((C, 1), lambda n, j: (0, 0),
                              pipeline_mode=pl.Buffered(1))
    else:
        w_spec = pl.BlockSpec((C, C), lambda n, j: (0, 0))
        b_spec = pl.BlockSpec((C, 1), lambda n, j: (0, 0))

    out3 = pl.pallas_call(
        kernel,
        out_shape=jax.ShapeDtypeStruct((N, C, HW), x_nchw.dtype),
        grid_spec=pltpu.PrefetchScalarGridSpec(
            num_scalar_prefetch=0,
            grid=(grid_n, grid_hw),
            in_specs=[
                pl.BlockSpec((NB, C, t), lambda n, j: (n, 0, j)),  # activations
                w_spec,                                            # weight (resident)
                b_spec,                                            # bias   (resident)
            ],
            out_specs=pl.BlockSpec((NB, C, t), lambda n, j: (n, 0, j)),
        ),
        compiler_params=pltpu.CompilerParams(
            dimension_semantics=("parallel", "parallel"),
            vmem_limit_bytes=vmem_limit),
    )(x3, weight, b2)

    return out3.reshape(N, C, H, W)


if __name__ == "__main__":
    key = jax.random.PRNGKey(0)
    kx, kw, kb = jax.random.split(key, 3)

    N, C, H, W = 2, 4, 16, 16
    x = jax.random.normal(kx, (N, C, H, W), dtype=jnp.float32)

    # Synthetic 1x1-conv parameters:  y[n,co,h,w] = sum_ci W[co,ci]*x[n,ci,h,w] + b[co]
    weight = jax.random.normal(kw, (C, C), dtype=jnp.float32) * 0.1
    bias = jax.random.normal(kb, (C,), dtype=jnp.float32) * 0.1

    out = residual_pointwise_conv(x, weight, bias)
    out = jax.block_until_ready(out)

    # Pure-JAX reference of Residual(Conv2d 1x1): channel mix + bias + x.
    ref = jnp.einsum("oc,nchw->nohw", weight, x) + bias[None, :, None, None] + x
    assert out.shape == (N, C, H, W)
    err = float(jnp.max(jnp.abs(out - ref)))
    assert jnp.allclose(out, ref, atol=1e-5, rtol=1e-5), err

    print("KERNEL_OK")
</pallas_src>

<mosaic_0001>
module attributes {stable_mosaic.version = 11 : i64} {
  func.func @kernel(%arg0: i32, %arg1: i32, %arg2: memref<1x4x256xf32, #tpu.memory_space<vmem>>, %arg3: memref<4x4xf32, #tpu.memory_space<vmem>>, %arg4: memref<4x1xf32, #tpu.memory_space<vmem>>, %arg5: memref<1x4x256xf32, #tpu.memory_space<vmem>>) attributes {dimension_semantics = [#tpu.dimension_semantics<parallel>, #tpu.dimension_semantics<parallel>], iteration_bounds = array<i64: 2, 1>, scalar_prefetch = 0 : i64, scratch_operands = 0 : i64, tpu.core_type = #tpu.core_type<tc>, window_params = [{transform_indices = @transform_0, window_bounds = array<i64: 1, 4, 256>}, {pipeline_mode = #tpu.pipeline_mode<synchronous>, transform_indices = @transform_1, window_bounds = array<i64: 4, 4>}, {pipeline_mode = #tpu.pipeline_mode<synchronous>, transform_indices = @transform_2, window_bounds = array<i64: 4, 1>}, {transform_indices = @transform_3, window_bounds = array<i64: 1, 4, 256>}]} {
    %c0 = arith.constant 0 : index
    %c0_0 = arith.constant 0 : index
    %0 = vector.load %arg4[%c0, %c0_0] : memref<4x1xf32, #tpu.memory_space<vmem>>, vector<4x1xf32>
    %c0_1 = arith.constant 0 : index
    %c0_2 = arith.constant 0 : index
    %1 = vector.load %arg3[%c0_1, %c0_2] : memref<4x4xf32, #tpu.memory_space<vmem>>, vector<4x4xf32>
    %c0_3 = arith.constant 0 : index
    %c0_4 = arith.constant 0 : index
    %c0_5 = arith.constant 0 : index
    %2 = vector.load %arg2[%c0_3, %c0_4, %c0_5] : memref<1x4x256xf32, #tpu.memory_space<vmem>>, vector<1x4x256xf32>
    %3 = vector.shape_cast %2 : vector<1x4x256xf32> to vector<4x256xf32>
    %4 = vector.extract_strided_slice %1 {offsets = [0, 0], sizes = [4, 1], strides = [1, 1]} : vector<4x4xf32> to vector<4x1xf32>
    %5 = vector.extract_strided_slice %3 {offsets = [0, 0], sizes = [1, 256], strides = [1, 1]} : vector<4x256xf32> to vector<1x256xf32>
    %6 = vector.broadcast %4 : vector<4x1xf32> to vector<4x256xf32>
    %7 = vector.broadcast %5 : vector<1x256xf32> to vector<4x256xf32>
    %8 = arith.mulf %6, %7 : vector<4x256xf32>
    %9 = vector.extract_strided_slice %1 {offsets = [0, 1], sizes = [4, 1], strides = [1, 1]} : vector<4x4xf32> to vector<4x1xf32>
    %10 = vector.extract_strided_slice %3 {offsets = [1, 0], sizes = [1, 256], strides = [1, 1]} : vector<4x256xf32> to vector<1x256xf32>
    %11 = vector.broadcast %9 : vector<4x1xf32> to vector<4x256xf32>
    %12 = vector.broadcast %10 : vector<1x256xf32> to vector<4x256xf32>
    %13 = arith.mulf %11, %12 : vector<4x256xf32>
    %14 = arith.addf %8, %13 : vector<4x256xf32>
    %15 = vector.extract_strided_slice %1 {offsets = [0, 2], sizes = [4, 1], strides = [1, 1]} : vector<4x4xf32> to vector<4x1xf32>
    %16 = vector.extract_strided_slice %3 {offsets = [2, 0], sizes = [1, 256], strides = [1, 1]} : vector<4x256xf32> to vector<1x256xf32>
    %17 = vector.broadcast %15 : vector<4x1xf32> to vector<4x256xf32>
    %18 = vector.broadcast %16 : vector<1x256xf32> to vector<4x256xf32>
    %19 = arith.mulf %17, %18 : vector<4x256xf32>
    %20 = arith.addf %14, %19 : vector<4x256xf32>
    %21 = vector.extract_strided_slice %1 {offsets = [0, 3], sizes = [4, 1], strides = [1, 1]} : vector<4x4xf32> to vector<4x1xf32>
    %22 = vector.extract_strided_slice %3 {offsets = [3, 0], sizes = [1, 256], strides = [1, 1]} : vector<4x256xf32> to vector<1x256xf32>
    %23 = vector.broadcast %21 : vector<4x1xf32> to vector<4x256xf32>
    %24 = vector.broadcast %22 : vector<1x256xf32> to vector<4x256xf32>
    %25 = arith.mulf %23, %24 : vector<4x256xf32>
    %26 = arith.addf %20, %25 : vector<4x256xf32>
    %27 = vector.broadcast %0 : vector<4x1xf32> to vector<4x256xf32>
    %28 = arith.addf %26, %27 : vector<4x256xf32>
    %29 = arith.addf %28, %3 : vector<4x256xf32>
    %c0_6 = arith.constant 0 : index
    %c0_7 = arith.constant 0 : index
    %c0_8 = arith.constant 0 : index
    %30 = vector.load %arg5[%c0_6, %c0_7, %c0_8] : memref<1x4x256xf32, #tpu.memory_space<vmem>>, vector<1x4x256xf32>
    %31 = vector.shape_cast %30 : vector<1x4x256xf32> to vector<4x256xf32>
    %32 = vector.shape_cast %29 : vector<4x256xf32> to vector<1x4x256xf32>
    tpu.vector_store %arg5[%c0_6, %c0_7, %c0_8], %32 {strides = array<i32>} : memref<1x4x256xf32, #tpu.memory_space<vmem>>, vector<1x4x256xf32>,
    return
  }
  func.func @transform_0(%arg0: i32, %arg1: i32) -> (i32, i32, i32) {
    %c0_i32 = arith.constant 0 : i32
    %c0_i32_0 = arith.constant 0 : i32
    return %arg0, %c0_i32, %arg1 : i32, i32, i32
  }
  func.func @transform_1(%arg0: i32, %arg1: i32) -> (i32, i32) {
    %c0_i32 = arith.constant 0 : i32
    %c0_i32_0 = arith.constant 0 : i32
    %c0_i32_1 = arith.constant 0 : i32
    return %c0_i32, %c0_i32_0 : i32, i32
  }
  func.func @transform_2(%arg0: i32, %arg1: i32) -> (i32, i32) {
    %c0_i32 = arith.constant 0 : i32
    %c0_i32_0 = arith.constant 0 : i32
    %c0_i32_1 = arith.constant 0 : i32
    return %c0_i32, %c0_i32_0 : i32, i32
  }
  func.func @transform_3(%arg0: i32, %arg1: i32) -> (i32, i32, i32) {
    %c0_i32 = arith.constant 0 : i32
    %c0_i32_0 = arith.constant 0 : i32
    return %arg0, %c0_i32, %arg1 : i32, i32, i32
  }
}

</mosaic_0001>

<bundles_post_ra>
// kernel: tpu_custom_call.1
= control target key start
LH: loop header
LB: loop body
LE: loop exit
PB: predicated region body
PF: predicated region fallthrough
CT: control target
= control target key end

     0   :  { %8 = vsyncpa [#allocation3], 0  ;;  %s801_s0 = inlined_call_operand.hbm [shape: f32[2,4,256], index: 0, kind: input, shape index: {}]   ;;  %s802_s1 = inlined_call_operand.vmem [shape: f32[4,4], index: 1, kind: input, shape index: {}]   ;;  %s803_s2 = inlined_call_operand.vmem [shape: f32[4,1], index: 2, kind: input, shape index: {}]   ;;  %s804_s3 = inlined_call_operand.hbm [shape: f32[2,4,256], index: 3, kind: output, shape index: {}]  }
   0x1   :  { %10 = vsyncpa [#allocation3 + $0x1], 0 }
   0x2   :  { %11 = vsyncpa [#allocation4], 0 }
   0x3   :  { %13 = vsyncpa [#allocation4 + $0x1], 0  ;;  %s657_s12 = smov 0   ;;  %s659_s13 = smov 0  }
   0x4   :  { %s661_s14 = smov 0   ;;  %s663_s15 = smov 0  }
   0x5   :  { %s665_s16 = smov 0   ;;  %s667_s17 = smov 0  }
   0x6 LB: > { %s431_s18 = sadd.s32 4294967295, %s629_s17   ;;  %s432_s19 = sadd.s32 4294967294, %s629_s17   ;;  %s629_s17 = sphi %s667_s17, %s19_s17   ;;  %s625_s16 = sphi %s665_s16, %s816_s16   ;;  %s621_s15 = sphi %s663_s15, %s815_s15   ;;  %s617_s14 = sphi %s661_s14, %s814_s14   ;;  %s613_s13 = sphi %s659_s13, %s813_s13   ;;  %s609_s12 = sphi %s657_s12, %s812_s12  }
   0x7   : > { %s31_s20 = sadd.s32 1, %s625_s16  ;;  %s40_s21 = sadd.s32 1, %s617_s14 }
   0x8   : > { %p33_p0 = scmp.ge.s32.totalorder %s31_s20, 2  ;;  %p47_p1 = scmp.ne.s32.totalorder %s617_s14, %s613_s13 }
   0x9   : > { %p48_p2 = scmp.eq.s32.totalorder %s629_s17, 0  ;;  %p53_p3 = scmp.ne.s32.totalorder %s613_s13, %s609_s12 }
   0xa   : > { %s818_s20 = smov (%p33_p0, %s31_s20), 0  ;;  %p54_p5 = scmp.eq.s32.totalorder %s431_s18, 0 }
   0xb   : > { %p698_p4 = por %p48_p2, %p47_p1  ;;  %s35_s23 = ssub.s32 %s625_s16, %s818_s20 }
   0xc   : > { %p121_p6 = scmp.eq.s32.totalorder %s431_s18, 1  ;;  %p38_p7 = scmp.eq.s32.totalorder %s35_s23, 0 }
   0xd   : > { %p704_p8 = por %p54_p5, %p53_p3  ;;  %p127_p10 = scmp.eq.s32.totalorder %s432_s19, 1 }
   0xe   : > { %p708_p9 = por %p121_p6, %p47_p1  ;;  %p460_p13 = scmp.lt.s32.totalorder %s629_s17, 2 }
   0xf   : > { %s713_s26 = scalar_select %p38_p7, %s617_s14, %s40_s21  }
  0x10   : > { %p715_p11 = por %p127_p10, %p53_p3  ;;  %s153_s28 = sand.u32 1, %s617_s14  }
  0x11   : > { %s435_s29 = sshll.u32 %s153_s28, 3  ;;  %s446_s30 = sshll.u32 %s625_s16, 7 }
  0x12   : > { %s808_s27 = scalar_select %p715_p11, 1, 0 }
  0x13   : > { %s165_s6 = scalar_lea.hbm %s801_s0, %s446_s30  ;;  %s157_s7 = scalar_lea.vmem [#allocation2], %s435_s29 }
  0x14   : > { %s167_s8 = sshll.u32 %s157_s7, 4  ;;  %p728_p0 = pnand %p460_p13, %p698_p4  ;;  %s168_s8 = int_to_ptr.vmem [resolvable:$true] %s167_s8 }
  0x15   : > { %p438_p1 = scmp.ge.s32.totalorder %s629_s17, 1  ;;  %p172_p2 = scmp.lt.s32.totalorder %s629_s17, 3 }
  0x16   : > { %s154_s10 = scalar_lea.sflag [#allocation3], %s153_s28  ;;  %p523_p3 = pneg %p728_p0 }
  0x17   : > { %s534_s11 = scalar_lea.vmem %s168_s8, 128  ;;  %s631_s18 = smov [#allocation2]  }
  0x18   : > { %p535_p5 = scmp.ne.s32.totalorder %s168_s8, %s534_s11  ;;  %s539_s19 = sshll.u32 %s631_s18, 4  ;;  %s540_s19 = int_to_ptr.vmem [resolvable:$false] %s539_s19 }
  0x19   : > { %s541_s21 = scalar_lea.vmem %s540_s19, 256  ;;  %p542_p10 = scmp.lt.s32.totalorder %s168_s8, %s540_s19 }
  0x1a   : > { %p537_p6 = pnand %p535_p5, %p523_p3  ;;  %p543_p12 = scmp.lt.s32.totalorder %s541_s21, %s534_s11 }
  0x1c   : > { %p538_p7 = pneg %p537_p6  ;;  %p544_p4 = por %p543_p12, %p542_p10 }
  0x1e   : > { %p545_p13 = pnand %p544_p4, %p538_p7 }
  0x20   : > { %548 = shalt.err (!%p545_p13)
}
  0x21   : > { %455 = dma.hbm_to_vmem [thread:$0]  (!%p728_p0), %s165_s6, 128, %s168_s8, %s154_s10  }
  0x22   : > { %p173_p11 = pnand %p438_p1, %p172_p2 }
  0x23   : > { %s743_s22 = sand.u32 (!%p173_p11), 1, %s613_s13  }
  0x24   : > { %176 = sbr.rel (%p173_p11) target bundleno = 200 (0xc8), region = 32  ;;  %s439_s23 = sshll.u32 (!%p173_p11), %s743_s22, 3 }
  0x25   : > { %s179_s28 = scalar_lea.sflag (!%p173_p11), [#allocation3], %s743_s22  ;;  %s182_s29 = scalar_lea.vmem (!%p173_p11), [#allocation2], %s439_s23 }
  0x29   : > { %600 = dma.done.wait (%p704_p8), %s179_s28, 128  }
  0x2a   : > { %602 = vsyncadd (%p704_p8), %s179_s28, 4294967168  ;;  %v632_v0 = vmov 0   ;;  %v633_v1 = vmov 2   ;;  %v208_v2 = vld [vmem:[%s802_s1] sm:$0xf]  ;;  %v634_v3 = vmov 1   ;;  %v216_v6 = vlaneseq }
  0x2b   : > { %514 = vset.pattern.permute.xlu0 %v632_v0  ;;  %516 = vset.pattern.permute.xlu1 %v633_v1  ;;  %v635_v4 = vmov 3   ;;  %v207_v5 = vld [vmem:[%s803_s2] sm:$0xf]  ;;  %s447_s24 = sshll.u32 %s621_s15, 7  ;;  %s204_s7 = scalar_lea.vmem [#allocation5], %s439_s23 }
  0x2c   : > { %212 = vperm.xlu0 %514, %v208_v2   ;;  %263 = vperm.xlu1 %516, %v208_v2   ;;  %v217_v7 = vshrl.u32 %v216_v6, 7  ;;  %v209_v12 = vld [vmem:[%s182_s29] sm:$0xff]  ;;  %s347_s8 = sshll.u32 %s204_s7, 4  ;;  %s345_s11 = scalar_lea.hbm %s804_s3, %s447_s24  ;;  %s348_s8 = int_to_ptr.vmem [resolvable:$true] %s347_s8 }
  0x2d   : > { %v321_v52 = vcombine.high %v209_v12, %v209_v12  ;;  %s331_s18 = scalar_lea.sflag [#allocation4], %s743_s22  ;;  %s549_s19 = scalar_lea.vmem %s348_s8, 128 }
  0x2e   : > { %v218_v8 = vsub.s32 0, %v217_v7  ;;  %v222_v9 = vsub.s32 4, %v217_v7  ;;  %v242_v10 = vsub.s32 1, %v217_v7  ;;  %v246_v11 = vsub.s32 5, %v217_v7  ;;  %p550_p8 = scmp.ne.s32.totalorder %s348_s8, %s549_s19  ;;  %s636_s21 = smov [#allocation5]  }
  0x2f   : > { %v268_v13 = vsub.s32 2, %v217_v7  ;;  %v272_v14 = vsub.s32 6, %v217_v7  ;;  %v294_v15 = vsub.s32 3, %v217_v7  ;;  %v298_v16 = vsub.s32 7, %v217_v7  ;;  %s553_s15 = sshll.u32 %s636_s21, 4  ;;  %s554_s15 = int_to_ptr.vmem [resolvable:$false] %s553_s15 }
  0x30   : > { %515 = vset.pattern.permute.xlu0 %v634_v3  ;;  %517 = vset.pattern.permute.xlu1 %v635_v4  ;;  %v219_v17 = vrot.slane %v209_v12, %v218_v8  ;;  %v223_v18 = vrot.slane %v209_v12, %v222_v9  ;;  %v243_v19 = vrot.slane %v209_v12, %v242_v10  ;;  %p551_p11 = pnand %p550_p8, %p708_p9  ;;  %s555_s23 = scalar_lea.vmem %s554_s15, 256 }
  0x31   : > { %237 = vperm.xlu0 %515, %v208_v2   ;;  %289 = vperm.xlu1 %517, %v208_v2   ;;  %v247_v20 = vrot.slane %v209_v12, %v246_v11  ;;  %v269_v21 = vrot.slane %v209_v12, %v268_v13  ;;  %v273_v22 = vrot.slane %v209_v12, %v272_v14  ;;  %p556_p0 = scmp.lt.s32.totalorder %s348_s8, %s554_s15  ;;  %p557_p1 = scmp.lt.s32.totalorder %s555_s23, %s549_s19 }
  0x32   : > { %v295_v25 = vrot.slane %v209_v12, %v294_v15  ;;  %v299_v26 = vrot.slane %v209_v12, %v298_v16  ;;  %v229_v27 = vrot.slane %v219_v17, %v218_v8  ;;  %v233_v28 = vrot.slane %v223_v18, %v218_v8  ;;  %p552_p12 = pneg %p551_p11 }
  0x33   : > { %v253_v29 = vrot.slane %v243_v19, %v242_v10  ;;  %v257_v30 = vrot.slane %v247_v20, %v242_v10  ;;  %v279_v31 = vrot.slane %v269_v21, %v268_v13  ;;  %v283_v32 = vrot.slane %v273_v22, %v268_v13  ;;  %p558_p2 = por %p557_p1, %p556_p0 }
  0x34   : > { %v305_v33 = vrot.slane %v295_v25, %v294_v15  ;;  %v309_v34 = vrot.slane %v299_v26, %v294_v15 }
  0x35   : > { %518 = vset.pattern.permute.xlu1 %v632_v0  ;;  %519 = vset.pattern.permute.xlu0 %v632_v0  ;;  %p559_p3 = pnand %p558_p2, %p552_p12 }
  0x36   : > { %316 = vperm.xlu1 %518, %v207_v5  }
  0xa7   : > { %v213_v23 = vpop.permute.xlu0 %212  ;;  %v264_v24 = vpop.permute.xlu1 %263 }
  0xa8   : > { %v234_v37 = vmul.f32 %v229_v27, %v213_v23  ;;  %v235_v38 = vmul.f32 %v233_v28, %v213_v23  ;;  %v284_v41 = vmul.f32 %v279_v31, %v264_v24  ;;  %v285_v42 = vmul.f32 %v283_v32, %v264_v24 }
  0xac   : > { %v238_v35 = vpop.permute.xlu0 %237  ;;  %v290_v36 = vpop.permute.xlu1 %289 }
  0xad   : > { %v258_v39 = vmul.f32 %v253_v29, %v238_v35  ;;  %v259_v40 = vmul.f32 %v257_v30, %v238_v35  ;;  %v310_v45 = vmul.f32 %v305_v33, %v290_v36  ;;  %v311_v46 = vmul.f32 %v309_v34, %v290_v36 }
  0xaf   : > { %v260_v43 = vadd.f32 %v258_v39, %v234_v37  ;;  %v261_v44 = vadd.f32 %v259_v40, %v235_v38 }
  0xb1   : > { %v286_v47 = vadd.f32 %v284_v41, %v260_v43  ;;  %v287_v48 = vadd.f32 %v285_v42, %v261_v44  ;;  %v317_v49 = vpop.permute.xlu1 %316 }
  0xb3   : > { %v312_v50 = vadd.f32 %v310_v45, %v286_v47  ;;  %v313_v51 = vadd.f32 %v311_v46, %v287_v48 }
  0xb5   : > { %v319_v53 = vadd.f32 %v317_v49, %v312_v50  ;;  %v320_v54 = vadd.f32 %v317_v49, %v313_v51 }
  0xb7   : > { %v323_v55 = vadd.f32 %v319_v53, %v209_v12  ;;  %v324_v56 = vadd.f32 %v321_v52, %v320_v54 }
  0xb9   : > { %v327_v57 = vcombine.low %v323_v55, %v324_v56 }
  0xbb   : > { %329 = vst [vmem:[%s204_s7] sm:$0xff] %v327_v57 }
  0xbc   : > { %562 = shalt.err (!%p559_p3)
}
  0xbd   : > { %s563_s28 = scalar_lea.hbm %s345_s11, 128  ;;  %s567_s30 = scalar_lea.hbm %s804_s3, 256 }
  0xbe   : > { %p564_p5 = scmp.ne.s32.totalorder %s345_s11, %s563_s28  ;;  %p568_p10 = scmp.lt.s32.totalorder %s345_s11, %s804_s3 }
  0xbf   : > { %p569_p4 = scmp.lt.s32.totalorder %s567_s30, %s563_s28 }
  0xc0   : > { %p565_p6 = pnand %p564_p5, %p708_p9 }
  0xc1   : > { %p570_p13 = por %p569_p4, %p568_p10 }
  0xc2   : > { %p566_p7 = pneg %p565_p6 }
  0xc4   : > { %p571_p8 = pnand %p570_p13, %p566_p7 }
  0xc6   : > { %574 = shalt.err (!%p571_p8)
}
  0xc7   : > { %450 = dma.vmem_to_hbm [thread:$0]  (%p708_p9), %s348_s8, 128, %s345_s11, %s331_s18  }
  0xc8 PF: > { %s359_s6 = sand.u32 1, %s609_s12   ;;  %p810_p11 = scmp.ne.s32.totalorder %s808_s27, 0 }
  0xc9   : > { %p811_p12 = scmp.ge.s32.totalorder %s629_s17, 2  ;;  %s360_s24 = scalar_lea.sflag [#allocation4], %s359_s6 }
  0xcb   : > { %p457_p0 = pnand %p811_p12, %p810_p11 }
  0xcd   : > { %p458_p1 = pneg %p457_p0 }
  0xcf   : > { %604 = dma.done.wait (%p458_p1), %s360_s24, 128  }
  0xd0   : > { %606 = vsyncadd (%p458_p1), %s360_s24, 4294967168  ;;  %s19_s17 = sadd.s32 1, %s629_s17   ;;  %s812_s12 = smov %s613_s13 }
  0xd1   : > { %p16_p2 = scmp.ge.s32.totalorder %s19_s17, 4   ;;  %s813_s13 = smov %s617_s14 }
  0xd2   : > { %s814_s14 = smov %s713_s26  ;;  %s815_s15 = smov %s625_s16 }
  0xd3   : > { %s816_s16 = smov %s818_s20  ;;  %18 = sbr.rel (!%p16_p2) target bundleno = 6 (0x6), region = 77 }
  0xd8   :  { %365 = vsyncpa [#allocation3], 1 }
  0xd9   :  { %367 = vsyncpa [#allocation3 + $0x1], 1 }
  0xda   :  { %368 = vsyncpa [#allocation4], 1 }
  0xdb   :  { %370 = vsyncpa [#allocation4 + $0x1], 1 }

</bundles_post_ra>
